<compile_context>
chip_gen: v7x
topology: tpu7x:2x2x1
jax: 0.10.0
libtpu: 0.0.40
codegen_flags: <defaults>
</compile_context>

<pallas_src>
import jax
import jax.numpy as jnp
from jax.experimental import pallas as pl
from jax.experimental.pallas import tpu as pltpu


def _round_up(x, m):
    return (x + m - 1) // m * m


def _conv_bn_relu_kernel(lhs_ref, rhs_ref, shift_ref, out_ref):
    # lhs_ref:   (tm, Kp)   bf16 im2col patch rows (K zero-padded to Kp)
    # rhs_ref:   (Kp, Cp)   bf16 conv weights with BN scale folded per column
    # shift_ref: (1, Cp)    f32 folded BN shift = beta - mean * scale
    # out_ref:   (tm, Cp)   lane-dense output block (Cp multiple of 128)
    acc = jnp.dot(lhs_ref[...], rhs_ref[...], preferred_element_type=jnp.float32)
    y = acc + shift_ref[...]
    out_ref[...] = jnp.maximum(y, 0.0).astype(out_ref.dtype)


def conv_bn_relu_forward(x, weight, gamma, beta, running_mean, running_var,
                         *, stride=1, eps=1e-5):
    """Pallas equivalent of ConvBNReLU(n_in, n_out, stride).forward(x).

    x:      (N, Cin, H, W)    NCHW, like PyTorch
    weight: (Cout, Cin, 3, 3) OIHW, like PyTorch (bias=False)
    BatchNorm uses the given running statistics (eval-mode BN).
    """
    N, Cin, H, W = x.shape
    Cout = weight.shape[0]
    KH = KW = 3
    Ho = (H + 2 - KH) // stride + 1
    Wo = (W + 2 - KW) // stride + 1

    K = KH * KW * Cin
    Kp = _round_up(K, 128)          # lane-aligned contraction dim
    Cp = _round_up(Cout, 128)       # lane-dense output stores
    M = N * Ho * Wo

    compute_dtype = jnp.bfloat16
    out_dtype = x.dtype
    lhs_bytes = jnp.dtype(compute_dtype).itemsize
    out_bytes = jnp.dtype(out_dtype).itemsize

    # ---- NHWC im2col (single fused pass, channel-minor, bf16) ---------------
    x_nhwc = jnp.transpose(x, (0, 2, 3, 1)).astype(compute_dtype)   # (N,H,W,Cin)
    xp = jnp.pad(x_nhwc, ((0, 0), (1, 1), (1, 1), (0, 0)))          # spatial pad=1

    taps = []
    for kh in range(KH):
        for kw in range(KW):
            taps.append(
                jax.lax.slice(
                    xp,
                    (0, kh, kw, 0),
                    (N, kh + (Ho - 1) * stride + 1,
                     kw + (Wo - 1) * stride + 1, Cin),
                    (1, stride, stride, 1),
                )                                            # (N, Ho, Wo, Cin)
            )
    if Kp > K:   # K zero-pad built directly into the concat (no extra pass)
        taps.append(jnp.zeros((N, Ho, Wo, Kp - K), compute_dtype))
    lhs = jnp.concatenate(taps, axis=-1).reshape(M, Kp)              # (M, Kp)

    # ---- fold BatchNorm (eval mode) into weights + per-channel shift --------
    inv_std = jax.lax.rsqrt(running_var.astype(jnp.float32) + eps)
    scale = gamma.astype(jnp.float32) * inv_std                       # (Cout,)
    shift = beta.astype(jnp.float32) - running_mean.astype(jnp.float32) * scale

    # weight (Cout,Cin,3,3) -> (kh,kw,Cin,Cout) -> (K,Cout); row order matches
    # the (kh, kw, cin) tap-column order built above. BN scale folded per col.
    rhs = weight.astype(jnp.float32).transpose(2, 3, 1, 0).reshape(K, Cout)
    rhs = rhs * scale[None, :]
    rhs = jnp.pad(rhs, ((0, Kp - K), (0, Cp - Cout))).astype(compute_dtype)
    shift_p = jnp.pad(shift, (0, Cp - Cout)).reshape(1, Cp)           # (1, Cp)

    # ---- per-chip tile sizing -----------------------------------------------
    try:
        vmem_cap = int(pltpu.get_tpu_info().vmem_capacity_bytes)
    except Exception:
        vmem_cap = 64 * 1024 * 1024        # conservative fallback (v7x per-TC)

    # 64 MiB scoped on v5e/v6e (128 MiB physical), 32 MiB on v7x (64 MiB).
    vmem_limit = min(vmem_cap // 2, 64 * 1024 * 1024)
    # Resident operands (rhs + shift, double-buffered) + safety margin.
    fixed = 2 * (Kp * Cp * lhs_bytes + 8 * Cp * 4) + (2 << 20)
    per_row = 2 * (Kp * lhs_bytes + Cp * out_bytes)      # dbl-buffered lhs+out
    budget = max(vmem_limit - fixed, per_row * 8)

    tm = min(2048, _round_up(M, 8), max(8, budget // per_row))
    tm = max(8, (tm // 8) * 8)

    # Make sure the "parallel" grid axis has >= 2 (ideally even) tiles so both
    # v7x TensorCores get work; harmless elsewhere.
    grid_m = pl.cdiv(M, tm)
    if grid_m < 2 and M > 8:
        tm = max(8, _round_up(pl.cdiv(M, 2), 8))
        grid_m = pl.cdiv(M, tm)
    elif grid_m > 2 and grid_m % 2 == 1:
        tm_try = max(8, _round_up(pl.cdiv(M, grid_m + 1), 8))
        if pl.cdiv(M, tm_try) % 2 == 0:
            tm = tm_try
            grid_m = pl.cdiv(M, tm)

    Mp = grid_m * tm
    if Mp > M:   # row pad via concat of zeros (fuses with the im2col producer)
        lhs = jnp.concatenate(
            [lhs, jnp.zeros((Mp - M, Kp), compute_dtype)], axis=0)

    flops = 2 * Mp * Kp * Cp + 2 * Mp * Cp
    bytes_accessed = (Mp * Kp * lhs_bytes + Kp * Cp * lhs_bytes
                      + Mp * Cp * out_bytes + Cp * 4)

    out = pl.pallas_call(
        _conv_bn_relu_kernel,
        out_shape=jax.ShapeDtypeStruct((Mp, Cp), out_dtype),
        grid_spec=pltpu.PrefetchScalarGridSpec(
            num_scalar_prefetch=0,
            grid=(grid_m,),
            in_specs=[
                pl.BlockSpec((tm, Kp), lambda i: (i, 0)),
                pl.BlockSpec((Kp, Cp), lambda i: (0, 0)),
                pl.BlockSpec((1, Cp), lambda i: (0, 0)),
            ],
            out_specs=pl.BlockSpec((tm, Cp), lambda i: (i, 0)),
        ),
        compiler_params=pltpu.CompilerParams(
            dimension_semantics=("parallel",),   # no reduction axis; megacore
            vmem_limit_bytes=int(vmem_limit),
        ),
        cost_estimate=pl.CostEstimate(
            flops=int(flops), transcendentals=0,
            bytes_accessed=int(bytes_accessed)),
    )(lhs, rhs, shift_p)

    # Drop row / channel padding and restore the module's NCHW contract.
    # (Slice + reshape + transpose fuse into one XLA pass; a consumer that
    # accepts NHWC / (M, Cout) could skip this entirely.)
    out = out[:M, :Cout]
    out = out.reshape(N, Ho, Wo, Cout).transpose(0, 3, 1, 2)
    return out


def _reference_forward(x, weight, gamma, beta, running_mean, running_var,
                       *, stride=1, eps=1e-5):
    conv = jax.lax.conv_general_dilated(
        x, weight,
        window_strides=(stride, stride),
        padding=((1, 1), (1, 1)),
        dimension_numbers=("NCHW", "OIHW", "NCHW"),
        precision=jax.lax.Precision.HIGHEST,
    )
    inv_std = jax.lax.rsqrt(running_var + eps)
    scale = (gamma * inv_std).reshape(1, -1, 1, 1)
    shift = (beta - running_mean * gamma * inv_std).reshape(1, -1, 1, 1)
    return jnp.maximum(conv * scale + shift, 0.0)


if __name__ == "__main__":
    key = jax.random.PRNGKey(0)
    kx, kw, kg, kb, km, kv = jax.random.split(key, 6)

    N, Cin, H, W = 2, 4, 16, 16
    Cout = 8

    x = jax.random.normal(kx, (N, Cin, H, W), dtype=jnp.float32)
    weight = jax.random.normal(kw, (Cout, Cin, 3, 3), dtype=jnp.float32) * 0.1
    gamma = 1.0 + 0.1 * jax.random.normal(kg, (Cout,), dtype=jnp.float32)
    beta = 0.1 * jax.random.normal(kb, (Cout,), dtype=jnp.float32)
    running_mean = 0.1 * jax.random.normal(km, (Cout,), dtype=jnp.float32)
    running_var = jax.random.uniform(kv, (Cout,), dtype=jnp.float32,
                                     minval=0.5, maxval=1.5)

    for stride in (1, 2):
        out = conv_bn_relu_forward(x, weight, gamma, beta,
                                   running_mean, running_var, stride=stride)
        out = jax.block_until_ready(out)

        ref = _reference_forward(x, weight, gamma, beta,
                                 running_mean, running_var, stride=stride)
        ref = jax.block_until_ready(ref)

        assert out.shape == ref.shape, (out.shape, ref.shape)
        # Tolerance accounts for bf16 input/weight quantization on the MXU
        # (f32 accumulation) vs the HIGHEST-precision XLA reference conv.
        assert jnp.allclose(out, ref, rtol=1e-2, atol=1e-2), (
            stride, float(jnp.max(jnp.abs(out - ref))))

    print("KERNEL_OK")
</pallas_src>

<mosaic_0001>
module attributes {stable_mosaic.version = 11 : i64} {
  func.func @_conv_bn_relu_kernel(%arg0: i32, %arg1: memref<256x128xbf16, #tpu.memory_space<vmem>>, %arg2: memref<128x128xbf16, #tpu.memory_space<vmem>>, %arg3: memref<1x128xf32, #tpu.memory_space<vmem>>, %arg4: memref<256x128xf32, #tpu.memory_space<vmem>>) attributes {dimension_semantics = [#tpu.dimension_semantics<parallel>], iteration_bounds = array<i64: 2>, scalar_prefetch = 0 : i64, scratch_operands = 0 : i64, tpu.core_type = #tpu.core_type<tc>, window_params = [{transform_indices = @transform_0, window_bounds = array<i64: 256, 128>}, {pipeline_mode = #tpu.pipeline_mode<synchronous>, transform_indices = @transform_1, window_bounds = array<i64: 128, 128>}, {pipeline_mode = #tpu.pipeline_mode<synchronous>, transform_indices = @transform_2, window_bounds = array<i64: 1, 128>}, {transform_indices = @transform_3, window_bounds = array<i64: 256, 128>}]} {
    %c0 = arith.constant 0 : index
    %c0_0 = arith.constant 0 : index
    %0 = vector.load %arg1[%c0, %c0_0] : memref<256x128xbf16, #tpu.memory_space<vmem>>, vector<256x128xbf16>
    %c0_1 = arith.constant 0 : index
    %c0_2 = arith.constant 0 : index
    %1 = vector.load %arg2[%c0_1, %c0_2] : memref<128x128xbf16, #tpu.memory_space<vmem>>, vector<128x128xbf16>
    %cst = arith.constant dense<0.000000e+00> : vector<256x128xf32>
    %2 = tpu.matmul %0, %1, %cst {dimension_numbers = #tpu.dot_dimension_numbers<[1], [0], [0], [1], [0, 0, 1, 1], [], []>} : vector<256x128xbf16>, vector<128x128xbf16>, vector<256x128xf32> -> vector<256x128xf32>
    %c0_3 = arith.constant 0 : index
    %c0_4 = arith.constant 0 : index
    %3 = vector.load %arg3[%c0_3, %c0_4] : memref<1x128xf32, #tpu.memory_space<vmem>>, vector<1x128xf32>
    %4 = vector.broadcast %3 : vector<1x128xf32> to vector<256x128xf32>
    %5 = arith.addf %2, %4 : vector<256x128xf32>
    %cst_5 = arith.constant 0.000000e+00 : f32
    %6 = vector.broadcast %cst_5 : f32 to vector<256x128xf32>
    %7 = arith.maximumf %5, %6 : vector<256x128xf32>
    %c0_6 = arith.constant 0 : index
    %c0_7 = arith.constant 0 : index
    %8 = vector.load %arg4[%c0_6, %c0_7] : memref<256x128xf32, #tpu.memory_space<vmem>>, vector<256x128xf32>
    tpu.vector_store %arg4[%c0_6, %c0_7], %7 {strides = array<i32>} : memref<256x128xf32, #tpu.memory_space<vmem>>, vector<256x128xf32>,
    return
  }
  func.func @transform_0(%arg0: i32) -> (i32, i32) {
    %c0_i32 = arith.constant 0 : i32
    %c0_i32_0 = arith.constant 0 : i32
    return %arg0, %c0_i32 : i32, i32
  }
  func.func @transform_1(%arg0: i32) -> (i32, i32) {
    %c0_i32 = arith.constant 0 : i32
    %c0_i32_0 = arith.constant 0 : i32
    %c0_i32_1 = arith.constant 0 : i32
    return %c0_i32, %c0_i32_0 : i32, i32
  }
  func.func @transform_2(%arg0: i32) -> (i32, i32) {
    %c0_i32 = arith.constant 0 : i32
    %c0_i32_0 = arith.constant 0 : i32
    %c0_i32_1 = arith.constant 0 : i32
    return %c0_i32, %c0_i32_0 : i32, i32
  }
  func.func @transform_3(%arg0: i32) -> (i32, i32) {
    %c0_i32 = arith.constant 0 : i32
    %c0_i32_0 = arith.constant 0 : i32
    return %arg0, %c0_i32 : i32, i32
  }
}

</mosaic_0001>

<bundles_post_ra>
// kernel: tpu_custom_call.1
= control target key start
LH: loop header
LB: loop body
LE: loop exit
PB: predicated region body
PF: predicated region fallthrough
CT: control target
= control target key end

     0   :  { %8 = vsyncpa [#allocation3], 0  ;;  %s1399_s0 = inlined_call_operand.hbm [shape: bf16[512,128], index: 0, kind: input, shape index: {}]   ;;  %s1400_s1 = inlined_call_operand.hbm [shape: bf16[128,128], index: 1, kind: input, shape index: {}]   ;;  %s1401_s2 = inlined_call_operand.vmem [shape: f32[1,128], index: 2, kind: input, shape index: {}]   ;;  %s1402_s3 = inlined_call_operand.hbm [shape: f32[512,128], index: 3, kind: output, shape index: {}]  }
   0x1   :  { %10 = vsyncpa [#allocation3 + $0x1], 0 }
   0x2   :  { %11 = vsyncpa [#allocation6], 0 }
   0x3   :  { %12 = vsyncpa [#allocation4], 0 }
   0x4   :  { %14 = vsyncpa [#allocation4 + $0x1], 0  ;;  %s1101_s12 = smov 0   ;;  %s1103_s13 = smov 0  }
   0x5   :  { %s1105_s14 = smov 0   ;;  %s1107_s15 = smov 0  }
   0x6 LB: > { %s1122_s16 = sadd.s32 4294967295, %s1072_s15   ;;  %s728_s17 = sadd.s32 4294967294, %s1072_s15   ;;  %s1072_s15 = sphi %s1107_s15, %s1422_s15   ;;  %s1068_s14 = sphi %s1105_s14, %s1421_s14   ;;  %s1064_s13 = sphi %s1103_s13, %s1420_s13   ;;  %s1060_s12 = sphi %s1101_s12, %s1419_s12  }
   0x7   : > { %p40_p0 = scmp.ne.s32.totalorder %s1064_s13, %s1060_s12  ;;  %p1403_p1 = scmp.eq.s32.totalorder %s1122_s16, 0 }
   0x8   : > { %p112_p3 = scmp.eq.s32.totalorder %s728_s17, 1  ;;  %p729_p5 = scmp.ge.s32.totalorder %s1072_s15, 1 }
   0x9   : > { %p1131_p4 = por %p1403_p1, %p40_p0  ;;  %p119_p7 = scmp.lt.s32.totalorder %s1072_s15, 3 }
   0xa   : > { %p1136_p6 = por %p112_p3, %p40_p0  ;;  %s1074_s21 = smov [#allocation5]  }
   0xb   : > { %s1406_s18 = scalar_select %p1131_p4, 1, 0 }
   0xc   : > { %s1407_s19 = scalar_select %p1136_p6, 1, 0 }
   0xd   : > { %p1141_p8 = pnand %p729_p5, %p119_p7  ;;  %s131_s22 = sshll.u32 %s1074_s21, 4  ;;  %s1145_s22 = int_to_ptr.vmem [resolvable:$true] %s131_s22 }
   0xe   : > { %s1157_s24 = sadd.s32 1, %s1072_s15   ;;  %s27_s25 = sadd.s32 1, %s1068_s14 }
   0xf   : > { %s1408_s20 = scalar_select %p1141_p8, 1, 0 }
  0x10   : > { %p867_p9 = pneg %p1141_p8  ;;  %s24_s26 = ssub.s32 %s1072_s15, %s1157_s24 }
  0x11   : > { %s944_s29 = scalar_lea.hbm %s1400_s1, 1024 }
  0x12   : > { %p1152_p11 = pnand %p867_p9, %p1403_p1  ;;  %p945_p12 = scmp.ne.s32.totalorder %s1400_s1, %s944_s29 }
  0x13   : > { %p951_p5 = scmp.lt.u32.totalorder %s944_s29, %s1400_s1 }
  0x14   : > { %p946_p13 = pneg %p1152_p11 }
  0x16   : > { %p947_p0 = pnand %p946_p13, %p945_p12 }
  0x18   : > { %p948_p3 = pneg %p947_p0 }
  0x1a   : > { %p953_p7 = pnand %p951_p5, %p948_p3 }
  0x1c   : > { %956 = shalt.err (!%p953_p7)
}
  0x1d   : > { %s957_s7 = scalar_lea.vmem %s1145_s22, 1024  ;;  %p965_p2 = scmp.lt.s32.totalorder %s1145_s22, %s1145_s22 }
  0x1e   : > { %p958_p9 = scmp.ne.s32.totalorder %s1145_s22, %s957_s7  ;;  %p966_p6 = scmp.lt.s32.totalorder %s957_s7, %s957_s7 }
  0x20   : > { %p960_p10 = pnand %p958_p9, %p946_p13  ;;  %p967_p4 = por %p966_p6, %p965_p2 }
  0x22   : > { %p961_p1 = pneg %p960_p10 }
  0x24   : > { %p968_p8 = pnand %p967_p4, %p961_p1 }
  0x26   : > { %971 = shalt.err (!%p968_p8)
}
  0x27   : > { %s1075_s8 = smov 64   ;;  %s1076_s9 = smov 4  }
  0x28   : > { %870 = dma.hbm_to_vmem [thread:$0]  (!%p1152_p11), %s1400_s1, 1024, %s1145_s22, [#allocation6], %s1075_s8, %s1075_s8, %s1076_s9  }
  0x29   : > { %p25_p1 = scmp.eq.s32.totalorder %s24_s26, 0  ;;  %p34_p2 = scmp.ne.s32.totalorder %s1068_s14, %s1064_s13 }
  0x2a   : > { %p35_p4 = scmp.eq.s32.totalorder %s1072_s15, 0  ;;  %p880_p6 = scmp.lt.s32.totalorder %s1072_s15, 2 }
  0x2b   : > { %s1191_s17 = scalar_select %p25_p1, %s1068_s14, %s27_s25  }
  0x2c   : > { %p36_p8 = por %p35_p4, %p34_p2  ;;  %p1410_p10 = scmp.eq.s32.totalorder %s1122_s16, 1 }
  0x2d   : > { %s148_s23 = sand.u32 1, %s1068_s14   ;;  %s769_s27 = sshll.u32 %s1072_s15, 11 }
  0x2e   : > { %p1195_p12 = por %p1410_p10, %p34_p2  ;;  %s732_s28 = sshll.u32 %s148_s23, 7 }
  0x2f   : > { %s1204_s4 = scalar_lea.hbm %s1399_s0, %s769_s27  ;;  %s152_s22 = scalar_lea.vmem [#allocation2], %s732_s28 }
  0x30   : > { %s159_s25 = sshll.u32 %s152_s22, 4  ;;  %p1206_p11 = pnand %p880_p6, %p36_p8  ;;  %s1210_s25 = int_to_ptr.vmem [resolvable:$true] %s159_s25 }
  0x31   : > { %s1212_s5 = scalar_lea.sflag [#allocation3], %s148_s23  ;;  %s972_s6 = scalar_lea.hbm %s1204_s4, 2048 }
  0x32   : > { %p973_p13 = scmp.ne.s32.totalorder %s1204_s4, %s972_s6  ;;  %p974_p0 = pneg %p1206_p11 }
  0x33   : > { %s977_s11 = scalar_lea.hbm %s1399_s0, 4096  ;;  %p978_p7 = scmp.lt.u32.totalorder %s1204_s4, %s1399_s0 }
  0x34   : > { %p975_p3 = pnand %p974_p0, %p973_p13  ;;  %p979_p9 = scmp.lt.u32.totalorder %s977_s11, %s972_s6 }
  0x35   : > { %p981_p2 = scmp.lt.u32.totalorder %s972_s6, %s1204_s4 }
  0x36   : > { %p976_p5 = pneg %p975_p3  ;;  %p980_p1 = por %p979_p9, %p978_p7 }
  0x38   : > { %p982_p4 = por %p981_p2, %p980_p1 }
  0x3a   : > { %p983_p6 = pnand %p982_p4, %p976_p5 }
  0x3c   : > { %986 = shalt.err (!%p983_p6)
}
  0x3d   : > { %s987_s23 = scalar_lea.vmem %s1210_s25, 2048  ;;  %s1077_s29 = smov [#allocation2]  }
  0x3e   : > { %p988_p8 = scmp.ne.s32.totalorder %s1210_s25, %s987_s23  ;;  %s992_s30 = sshll.u32 %s1077_s29, 4  ;;  %s993_s30 = int_to_ptr.vmem [resolvable:$false] %s992_s30 }
  0x3f   : > { %s994_s22 = scalar_lea.vmem %s993_s30, 4096  ;;  %p995_p3 = scmp.lt.s32.totalorder %s1210_s25, %s993_s30 }
  0x40   : > { %p990_p10 = pnand %p988_p8, %p974_p0  ;;  %p996_p7 = scmp.lt.s32.totalorder %s994_s22, %s987_s23 }
  0x42   : > { %p991_p13 = pneg %p990_p10  ;;  %p997_p9 = por %p996_p7, %p995_p3 }
  0x44   : > { %p998_p1 = pnand %p997_p9, %p991_p13 }
  0x46   : > { %1001 = shalt.err (!%p998_p1)
}
  0x47   : > { %874 = dma.hbm_to_vmem [thread:$0]  (!%p1206_p11), %s1204_s4, 2048, %s1210_s25, %s1212_s5, %s1075_s8, %s1075_s8, %s1076_s9  }
  0x48   : > { %p1413_p0 = scmp.ne.s32.totalorder %s1408_s20, 0 }
  0x49   : > { %s1246_s6 = sand.u32 (!%p1413_p0), 1, %s1064_s13   ;;  %p1414_p5 = scmp.ne.s32.totalorder (!%p1413_p0), %s1406_s18, 0 }
  0x4a   : > { %171 = sbr.rel (%p1413_p0) target bundleno = 376 (0x178), region = 32  ;;  %s736_s7 = sshll.u32 (!%p1413_p0), %s1246_s6, 7 }
  0x4b   : > { %s174_s10 = scalar_lea.sflag (!%p1413_p0), [#allocation3], %s1246_s6  ;;  %s1250_s11 = scalar_lea.vmem (!%p1413_p0), [#allocation2], %s736_s7 }
  0x51   : > { %1047 = dma.done.wait (%p1414_p5), %s174_s10, 2048  }
  0x52   : > { %1049 = vsyncadd (%p1414_p5), %s174_s10, 4294965248  ;;  %p1415_p11 = scmp.eq.s32.totalorder %s1122_s16, 0 }
  0x54   : > { %1051 = dma.done.wait (%p1415_p11), [#allocation6], 1024   ;;  %p1416_p2 = pmov %p1415_p11 }
  0x55   : > { %v920_v0 = vld [vmem:[#allocation5] sm:$0xff]   ;;  %v921_v1 = vld [vmem:[#allocation5 + $0x8] sm:$0xff]   ;;  %v922_v2 = vld [vmem:[#allocation5 + $0x10] sm:$0xff]   ;;  %s738_s8 = sshll.u32 %s1246_s6, 8  ;;  %s770_s4 = sshll.u32 %s1122_s16, 12 }
  0x56   : > { %1053 = vsyncadd (%p1416_p2), [#allocation6], 4294966272  ;;  %795 = vmatprep.subr.bf16.mxu0 %v920_v0  ;;  %843 = vmatprep.subr.bf16.mxu1 %v920_v0  ;;  %v923_v3 = vld [vmem:[#allocation5 + $0x18] sm:$0xff]   ;;  %v928_v4 = vld [vmem:[%s1250_s11] sm:$0xff]   ;;  %s1290_s9 = scalar_lea.vmem [#allocation7], %s738_s8  ;;  %s1347_s5 = scalar_lea.hbm %s1402_s3, %s770_s4 }
  0x57   : > { %796 = vmatpush3.bf16.msra.mxu0 %v920_v0  ;;  %851 = vmatpush3.bf16.msra.mxu1 %v920_v0  ;;  %v929_v5 = vld [vmem:[%s1250_s11 + $0x40] sm:$0xff]   ;;  %v925_v7 = vld [vmem:[#allocation5 + $0x28] sm:$0xff]   ;;  %v926_v8 = vld [vmem:[#allocation5 + $0x30] sm:$0xff]   ;;  %s645_s25 = sshll.u32 %s1290_s9, 4  ;;  %s632_s27 = scalar_lea.sflag [#allocation4], %s1246_s6  ;;  %s1349_s25 = int_to_ptr.vmem [resolvable:$true] %s645_s25 }
  0x58   : > { %797 = vmatprep.subr.bf16.mxu0 %v921_v1  ;;  %844 = vmatprep.subr.bf16.mxu1 %v921_v1  ;;  %v924_v6 = vld [vmem:[#allocation5 + $0x20] sm:$0xff]   ;;  %v927_v9 = vld [vmem:[#allocation5 + $0x38] sm:$0xff]   ;;  %v930_v10 = vld [vmem:[%s1250_s11 + $0x8] sm:$0xff]   ;;  %s1002_s28 = scalar_lea.vmem %s1349_s25, 4096  ;;  %s1078_s23 = smov [#allocation7]  }
  0x59   : > { %811 = vmatprep.mubr.bf16.mxu0 %v928_v4  ;;  %827 = vmatprep.mubr.bf16.mxu1 %v929_v5  ;;  %v931_v11 = vld [vmem:[%s1250_s11 + $0x48] sm:$0xff]   ;;  %v932_v12 = vld [vmem:[%s1250_s11 + $0x10] sm:$0xff]   ;;  %v934_v14 = vld [vmem:[%s1250_s11 + $0x18] sm:$0xff]   ;;  %p1003_p4 = scmp.ne.s32.totalorder %s1349_s25, %s1002_s28  ;;  %s1006_s29 = sshll.u32 %s1078_s23, 4  ;;  %s1007_s29 = int_to_ptr.vmem [resolvable:$false] %s1006_s29 }
  0x5a   : > { %v933_v13 = vld [vmem:[%s1250_s11 + $0x50] sm:$0xff]   ;;  %v935_v15 = vld [vmem:[%s1250_s11 + $0x58] sm:$0xff]   ;;  %v936_v16 = vld [vmem:[%s1250_s11 + $0x20] sm:$0xff]   ;;  %s1008_s30 = scalar_lea.vmem %s1007_s29, 8192  ;;  %p1009_p10 = scmp.lt.s32.totalorder %s1349_s25, %s1007_s29 }
  0x5b   : > { %798 = vmatpush3.bf16.msra.mxu0 %v921_v1  ;;  %852 = vmatpush3.bf16.msra.mxu1 %v921_v1  ;;  %v937_v17 = vld [vmem:[%s1250_s11 + $0x60] sm:$0xff]   ;;  %v938_v18 = vld [vmem:[%s1250_s11 + $0x28] sm:$0xff]   ;;  %v940_v20 = vld [vmem:[%s1250_s11 + $0x30] sm:$0xff]   ;;  %p1004_p6 = pnand %p1003_p4, %p1195_p12  ;;  %p1010_p13 = scmp.lt.s32.totalorder %s1008_s30, %s1002_s28 }
  0x5c   : > { %799 = vmatprep.subr.bf16.mxu0 %v922_v2  ;;  %845 = vmatprep.subr.bf16.mxu1 %v922_v2  ;;  %v939_v19 = vld [vmem:[%s1250_s11 + $0x68] sm:$0xff]   ;;  %v941_v21 = vld [vmem:[%s1250_s11 + $0x70] sm:$0xff]   ;;  %v942_v22 = vld [vmem:[%s1250_s11 + $0x38] sm:$0xff]  }
  0x5d   : > { %v943_v23 = vld [vmem:[%s1250_s11 + $0x78] sm:$0xff]   ;;  %v1279_v24 = vld [vmem:[%s1401_s2] ss:$0 sm:$0xff]  ;;  %p1005_p8 = pneg %p1004_p6  ;;  %p1011_p3 = por %p1010_p13, %p1009_p10 }
  0x5f   : > { %800 = vmatpush3.bf16.msra.mxu0 %v922_v2  ;;  %853 = vmatpush3.bf16.msra.mxu1 %v922_v2  ;;  %p1012_p7 = pnand %p1011_p3, %p1005_p8 }
  0x60   : > { %801 = vmatprep.subr.bf16.mxu0 %v923_v3  ;;  %846 = vmatprep.subr.bf16.mxu1 %v923_v3 }
  0x63   : > { %802 = vmatpush3.bf16.msra.mxu0 %v923_v3  ;;  %854 = vmatpush3.bf16.msra.mxu1 %v923_v3 }
  0x64   : > { %803 = vmatprep.subr.bf16.mxu0 %v924_v6  ;;  %847 = vmatprep.subr.bf16.mxu1 %v924_v6 }
  0x67   : > { %804 = vmatpush3.bf16.msra.mxu0 %v924_v6  ;;  %855 = vmatpush3.bf16.msra.mxu1 %v924_v6 }
  0x68   : > { %805 = vmatprep.subr.bf16.mxu0 %v925_v7  ;;  %848 = vmatprep.subr.bf16.mxu1 %v925_v7 }
  0x6b   : > { %806 = vmatpush3.bf16.msra.mxu0 %v925_v7  ;;  %856 = vmatpush3.bf16.msra.mxu1 %v925_v7 }
  0x6c   : > { %807 = vmatprep.subr.bf16.mxu0 %v926_v8  ;;  %849 = vmatprep.subr.bf16.mxu1 %v926_v8 }
  0x6f   : > { %808 = vmatpush3.bf16.msra.mxu0 %v926_v8  ;;  %857 = vmatpush3.bf16.msra.mxu1 %v926_v8 }
  0x70   : > { %809 = vmatprep.subr.bf16.mxu0 %v927_v9  ;;  %850 = vmatprep.subr.bf16.mxu1 %v927_v9 }
  0x73   : > { %810 = vmatpush3.bf16.msra.mxu0 %v927_v9  ;;  %858 = vmatpush3.bf16.msra.mxu1 %v927_v9 }
  0x76   : > { %812 = vmatmul.mubr.bf16.vlgmr.msra.gmra.mrb[0].mxu0 %v930_v10  ;;  %828 = vmatmul.mubr.bf16.vlgmr.msra.gmra.mrb[0].mxu1 %v931_v11 }
  0x77   : > { %815 = vmatprep.mubr.bf16.mxu0 %v932_v12  ;;  %831 = vmatprep.mubr.bf16.mxu1 %v933_v13 }
  0x7e   : > { %816 = vmatmul.mubr.bf16.gmra.mrb[4].mxu0 %v934_v14  ;;  %832 = vmatmul.mubr.bf16.gmra.mrb[4].mxu1 %v935_v15 }
  0x7f   : > { %819 = vmatprep.mubr.bf16.mxu0 %v936_v16  ;;  %835 = vmatprep.mubr.bf16.mxu1 %v937_v17 }
  0x86   : > { %820 = vmatmul.mubr.bf16.gmra.mrb[8].mxu0 %v938_v18  ;;  %836 = vmatmul.mubr.bf16.gmra.mrb[8].mxu1 %v939_v19 }
  0x87   : > { %823 = vmatprep.mubr.bf16.mxu0 %v940_v20  ;;  %839 = vmatprep.mubr.bf16.mxu1 %v941_v21 }
  0x8e   : > { %824 = vmatmul.mubr.bf16.gmra.mrb[12].mxu0 %v942_v22  ;;  %840 = vmatmul.mubr.bf16.gmra.mrb[12].mxu1 %v943_v23 }
 0x149   : > { %v813_v25 = vpop.f32.mrb[0].mxu0  ;;  %v829_v26 = vpop.f32.mrb[0].mxu1 }
 0x14a   : > { %v449_v27 = vadd.f32 %v813_v25, %v1279_v24  ;;  %v513_v28 = vadd.f32 %v829_v26, %v1279_v24  ;;  %v440_v29 = vpop.f32.mrb[1].mxu0  ;;  %v504_v30 = vpop.f32.mrb[1].mxu1 }
 0x14b   : > { %v441_v31 = vadd.f32 %v1279_v24, %v440_v29  ;;  %v505_v32 = vadd.f32 %v1279_v24, %v504_v30  ;;  %v814_v33 = vpop.f32.mrb[2].mxu0  ;;  %v830_v34 = vpop.f32.mrb[2].mxu1 }
 0x14c   : > { %v569_v35 = vmax.f32 %v449_v27, 0.0  ;;  %v585_v36 = vmax.f32 %v513_v28, 0.0  ;;  %v452_v37 = vadd.f32 %v814_v33, %v1279_v24  ;;  %v516_v38 = vadd.f32 %v830_v34, %v1279_v24  ;;  %v443_v39 = vpop.f32.mrb[3].mxu0  ;;  %v507_v40 = vpop.f32.mrb[3].mxu1 }
 0x14d   : > { %v567_v41 = vmax.f32 %v441_v31, 0.0  ;;  %v583_v42 = vmax.f32 %v505_v32, 0.0  ;;  %v444_v43 = vadd.f32 %v1279_v24, %v443_v39  ;;  %v508_v44 = vadd.f32 %v1279_v24, %v507_v40 }
 0x14e   : > { %601 = vst [vmem:[%s1290_s9 + $0x10] sm:$0xff] %v569_v35  ;;  %617 = vst [vmem:[%s1290_s9 + $0x90] sm:$0xff] %v585_v36  ;;  %v570_v45 = vmax.f32 %v452_v37, 0.0  ;;  %v586_v46 = vmax.f32 %v516_v38, 0.0 }
 0x14f   : > { %599 = vst [vmem:[%s1290_s9] sm:$0xff] %v567_v41  ;;  %615 = vst [vmem:[%s1290_s9 + $0x80] sm:$0xff] %v583_v42  ;;  %v568_v47 = vmax.f32 %v444_v43, 0.0  ;;  %v584_v48 = vmax.f32 %v508_v44, 0.0 }
 0x150   : > { %602 = vst [vmem:[%s1290_s9 + $0x18] sm:$0xff] %v570_v45  ;;  %618 = vst [vmem:[%s1290_s9 + $0x98] sm:$0xff] %v586_v46 }
 0x151   : > { %600 = vst [vmem:[%s1290_s9 + $0x8] sm:$0xff] %v568_v47  ;;  %616 = vst [vmem:[%s1290_s9 + $0x88] sm:$0xff] %v584_v48  ;;  %v817_v49 = vpop.f32.mrb[4].mxu0  ;;  %v833_v50 = vpop.f32.mrb[4].mxu1 }
 0x152   : > { %v465_v51 = vadd.f32 %v817_v49, %v1279_v24  ;;  %v529_v52 = vadd.f32 %v833_v50, %v1279_v24  ;;  %v456_v53 = vpop.f32.mrb[5].mxu0  ;;  %v520_v54 = vpop.f32.mrb[5].mxu1 }
 0x153   : > { %v457_v55 = vadd.f32 %v1279_v24, %v456_v53  ;;  %v521_v56 = vadd.f32 %v1279_v24, %v520_v54  ;;  %v818_v57 = vpop.f32.mrb[6].mxu0  ;;  %v834_v58 = vpop.f32.mrb[6].mxu1 }
 0x154   : > { %v573_v59 = vmax.f32 %v465_v51, 0.0  ;;  %v589_v60 = vmax.f32 %v529_v52, 0.0  ;;  %v468_v61 = vadd.f32 %v818_v57, %v1279_v24  ;;  %v532_v62 = vadd.f32 %v834_v58, %v1279_v24  ;;  %v459_v63 = vpop.f32.mrb[7].mxu0  ;;  %v523_v0 = vpop.f32.mrb[7].mxu1 }
 0x155   : > { %v571_v1 = vmax.f32 %v457_v55, 0.0  ;;  %v587_v2 = vmax.f32 %v521_v56, 0.0  ;;  %v460_v3 = vadd.f32 %v1279_v24, %v459_v63  ;;  %v524_v4 = vadd.f32 %v1279_v24, %v523_v0 }
 0x156   : > { %605 = vst [vmem:[%s1290_s9 + $0x30] sm:$0xff] %v573_v59  ;;  %621 = vst [vmem:[%s1290_s9 + $0xb0] sm:$0xff] %v589_v60  ;;  %v574_v5 = vmax.f32 %v468_v61, 0.0  ;;  %v590_v6 = vmax.f32 %v532_v62, 0.0 }
 0x157   : > { %603 = vst [vmem:[%s1290_s9 + $0x20] sm:$0xff] %v571_v1  ;;  %619 = vst [vmem:[%s1290_s9 + $0xa0] sm:$0xff] %v587_v2  ;;  %v572_v7 = vmax.f32 %v460_v3, 0.0  ;;  %v588_v8 = vmax.f32 %v524_v4, 0.0 }
 0x158   : > { %606 = vst [vmem:[%s1290_s9 + $0x38] sm:$0xff] %v574_v5  ;;  %622 = vst [vmem:[%s1290_s9 + $0xb8] sm:$0xff] %v590_v6 }
 0x159   : > { %604 = vst [vmem:[%s1290_s9 + $0x28] sm:$0xff] %v572_v7  ;;  %620 = vst [vmem:[%s1290_s9 + $0xa8] sm:$0xff] %v588_v8  ;;  %v821_v9 = vpop.f32.mrb[8].mxu0  ;;  %v837_v10 = vpop.f32.mrb[8].mxu1 }
 0x15a   : > { %v481_v11 = vadd.f32 %v821_v9, %v1279_v24  ;;  %v545_v12 = vadd.f32 %v837_v10, %v1279_v24  ;;  %v472_v13 = vpop.f32.mrb[9].mxu0  ;;  %v536_v14 = vpop.f32.mrb[9].mxu1 }
 0x15b   : > { %v473_v15 = vadd.f32 %v1279_v24, %v472_v13  ;;  %v537_v16 = vadd.f32 %v1279_v24, %v536_v14  ;;  %v822_v17 = vpop.f32.mrb[10].mxu0  ;;  %v838_v18 = vpop.f32.mrb[10].mxu1 }
 0x15c   : > { %v577_v19 = vmax.f32 %v481_v11, 0.0  ;;  %v593_v20 = vmax.f32 %v545_v12, 0.0  ;;  %v484_v21 = vadd.f32 %v822_v17, %v1279_v24  ;;  %v548_v22 = vadd.f32 %v838_v18, %v1279_v24  ;;  %v475_v23 = vpop.f32.mrb[11].mxu0  ;;  %v539_v25 = vpop.f32.mrb[11].mxu1 }
 0x15d   : > { %v575_v26 = vmax.f32 %v473_v15, 0.0  ;;  %v591_v27 = vmax.f32 %v537_v16, 0.0  ;;  %v476_v28 = vadd.f32 %v1279_v24, %v475_v23  ;;  %v540_v29 = vadd.f32 %v1279_v24, %v539_v25 }
 0x15e   : > { %609 = vst [vmem:[%s1290_s9 + $0x50] sm:$0xff] %v577_v19  ;;  %625 = vst [vmem:[%s1290_s9 + $0xd0] sm:$0xff] %v593_v20  ;;  %v578_v30 = vmax.f32 %v484_v21, 0.0  ;;  %v594_v31 = vmax.f32 %v548_v22, 0.0 }
 0x15f   : > { %607 = vst [vmem:[%s1290_s9 + $0x40] sm:$0xff] %v575_v26  ;;  %623 = vst [vmem:[%s1290_s9 + $0xc0] sm:$0xff] %v591_v27  ;;  %v576_v32 = vmax.f32 %v476_v28, 0.0  ;;  %v592_v33 = vmax.f32 %v540_v29, 0.0 }
 0x160   : > { %610 = vst [vmem:[%s1290_s9 + $0x58] sm:$0xff] %v578_v30  ;;  %626 = vst [vmem:[%s1290_s9 + $0xd8] sm:$0xff] %v594_v31 }
 0x161   : > { %608 = vst [vmem:[%s1290_s9 + $0x48] sm:$0xff] %v576_v32  ;;  %624 = vst [vmem:[%s1290_s9 + $0xc8] sm:$0xff] %v592_v33  ;;  %v825_v34 = vpop.f32.mrb[12].mxu0  ;;  %v841_v35 = vpop.f32.mrb[12].mxu1 }
 0x162   : > { %v497_v36 = vadd.f32 %v825_v34, %v1279_v24  ;;  %v561_v37 = vadd.f32 %v841_v35, %v1279_v24  ;;  %v488_v38 = vpop.f32.mrb[13].mxu0  ;;  %v552_v39 = vpop.f32.mrb[13].mxu1 }
 0x163   : > { %v489_v40 = vadd.f32 %v1279_v24, %v488_v38  ;;  %v553_v41 = vadd.f32 %v1279_v24, %v552_v39  ;;  %v826_v42 = vpop.f32.mrb[14].mxu0  ;;  %v842_v43 = vpop.f32.mrb[14].mxu1 }
 0x164   : > { %v581_v44 = vmax.f32 %v497_v36, 0.0  ;;  %v597_v45 = vmax.f32 %v561_v37, 0.0  ;;  %v500_v46 = vadd.f32 %v826_v42, %v1279_v24  ;;  %v564_v47 = vadd.f32 %v842_v43, %v1279_v24  ;;  %v491_v48 = vpop.f32.mrb[15].mxu0  ;;  %v555_v49 = vpop.f32.mrb[15].mxu1 }
 0x165   : > { %v579_v50 = vmax.f32 %v489_v40, 0.0  ;;  %v595_v51 = vmax.f32 %v553_v41, 0.0  ;;  %v492_v52 = vadd.f32 %v1279_v24, %v491_v48  ;;  %v556_v53 = vadd.f32 %v1279_v24, %v555_v49 }
 0x166   : > { %613 = vst [vmem:[%s1290_s9 + $0x70] sm:$0xff] %v581_v44  ;;  %629 = vst [vmem:[%s1290_s9 + $0xf0] sm:$0xff] %v597_v45  ;;  %v582_v54 = vmax.f32 %v500_v46, 0.0  ;;  %v598_v55 = vmax.f32 %v564_v47, 0.0 }
 0x167   : > { %611 = vst [vmem:[%s1290_s9 + $0x60] sm:$0xff] %v579_v50  ;;  %627 = vst [vmem:[%s1290_s9 + $0xe0] sm:$0xff] %v595_v51  ;;  %v580_v56 = vmax.f32 %v492_v52, 0.0  ;;  %v596_v57 = vmax.f32 %v556_v53, 0.0 }
 0x168   : > { %614 = vst [vmem:[%s1290_s9 + $0x78] sm:$0xff] %v582_v54  ;;  %630 = vst [vmem:[%s1290_s9 + $0xf8] sm:$0xff] %v598_v55 }
 0x169   : > { %612 = vst [vmem:[%s1290_s9 + $0x68] sm:$0xff] %v580_v56  ;;  %628 = vst [vmem:[%s1290_s9 + $0xe8] sm:$0xff] %v596_v57 }
 0x16a   : > { %1015 = shalt.err (!%p1012_p7)
}
 0x16b   : > { %s1016_s22 = scalar_lea.hbm %s1347_s5, 4096  ;;  %s1020_s11 = scalar_lea.hbm %s1402_s3, 8192 }
 0x16c   : > { %p1017_p9 = scmp.ne.s32.totalorder %s1347_s5, %s1016_s22  ;;  %p1021_p5 = scmp.lt.u32.totalorder %s1347_s5, %s1402_s3 }
 0x16d   : > { %p1022_p11 = scmp.lt.u32.totalorder %s1020_s11, %s1016_s22  ;;  %p1024_p4 = scmp.lt.u32.totalorder %s1016_s22, %s1347_s5 }
 0x16e   : > { %p1018_p1 = pnand %p1017_p9, %p1195_p12 }
 0x16f   : > { %p1023_p2 = por %p1022_p11, %p1021_p5 }
 0x170   : > { %p1019_p0 = pneg %p1018_p1 }
 0x171   : > { %p1025_p6 = por %p1024_p4, %p1023_p2 }
 0x173   : > { %p1026_p8 = pnand %p1025_p6, %p1019_p0 }
 0x175   : > { %1029 = shalt.err (!%p1026_p8)
}
 0x176   : > { %s1079_s8 = smov 128   ;;  %s1080_s9 = smov 8  }
 0x177   : > { %865 = dma.vmem_to_hbm [thread:$0]  (%p1195_p12), %s1349_s25, 4096, %s1347_s5, %s632_s27, %s1079_s8, %s1079_s8, %s1080_s9  }
 0x178 PF: > { %s660_s4 = sand.u32 1, %s1060_s12   ;;  %p1417_p10 = scmp.ne.s32.totalorder %s1407_s19, 0 }
 0x179   : > { %p1418_p13 = scmp.ge.s32.totalorder %s1072_s15, 2  ;;  %s661_s16 = scalar_lea.sflag [#allocation4], %s660_s4 }
 0x17b   : > { %p876_p3 = pnand %p1418_p13, %p1417_p10 }
 0x17d   : > { %1055 = dma.done.wait (!%p876_p3), %s661_s16, 4096  }
 0x17e   : > { %1057 = vsyncadd (!%p876_p3), %s661_s16, 4294963200  ;;  %p17_p7 = scmp.ge.s32.totalorder %s1157_s24, 4   ;;  %s1419_s12 = smov %s1064_s13 }
 0x17f   : > { %s1420_s13 = smov %s1068_s14  ;;  %s1421_s14 = smov %s1191_s17 }
 0x180   : > { %s1422_s15 = smov %s1157_s24  ;;  %19 = sbr.rel (!%p17_p7) target bundleno = 6 (0x6), region = 81 }
 0x187   :  { %666 = vsyncpa [#allocation3], 1 }
 0x188   :  { %668 = vsyncpa [#allocation3 + $0x1], 1 }
 0x189   :  { %669 = vsyncpa [#allocation6], 1 }
 0x18a   :  { %670 = vsyncpa [#allocation4], 1 }
 0x18b   :  { %672 = vsyncpa [#allocation4 + $0x1], 1 }

</bundles_post_ra>
